<compile_context>
chip_gen: v7x
topology: tpu7x:2x2x1
jax: 0.10.0
libtpu: 0.0.40
codegen_flags: <defaults>
</compile_context>

<pallas_src>
import math
from functools import partial

import jax
import jax.numpy as jnp
from jax.experimental import pallas as pl
from jax.experimental.pallas import tpu as pltpu

_LANE = 128


# ----------------------------------------------------------------------------
# Parameter (buffer) construction — mirrors PositionalEncoding.__init__
# ----------------------------------------------------------------------------
def make_pe(d_model: int, max_len: int = 100) -> jnp.ndarray:
    position = jnp.arange(max_len, dtype=jnp.float32)[:, None]            # (max_len, 1)
    div_term = jnp.exp(
        jnp.arange(0, d_model, 2, dtype=jnp.float32) * (-math.log(10000.0) / d_model)
    )                                                                      # (ceil(d/2),)
    angles = position * div_term                                           # (max_len, ceil(d/2))
    pe = jnp.zeros((max_len, d_model), dtype=jnp.float32)
    pe = pe.at[:, 0::2].set(jnp.sin(angles))
    pe = pe.at[:, 1::2].set(jnp.cos(angles)[:, : d_model // 2])            # odd d_model safe
    return pe


# ----------------------------------------------------------------------------
# Budgets (chip-aware, with a conservative fallback)
# ----------------------------------------------------------------------------
_BUDGETS = None


def _budgets():
    """Returns (target_block_bytes, vmem_limit_bytes)."""
    global _BUDGETS
    if _BUDGETS is None:
        try:
            vmem = getattr(pltpu.get_tpu_info(), "vmem_capacity_bytes", 64 * 1024 * 1024)
        except Exception:  # noqa: BLE001 - never fail on an introspection call
            vmem = 64 * 1024 * 1024
        if vmem >= 96 * 1024 * 1024:
            # v5e / v6e: 128 MiB VMEM -> bigger blocks amortize ~0.35us/step further.
            _BUDGETS = (8 * 1024 * 1024, 64 * 1024 * 1024)
        else:
            # v7x (64 MiB VMEM) or unknown: 4 MiB blocks, 2x(in)+2x(out)+pe < 48 MiB.
            _BUDGETS = (4 * 1024 * 1024, 48 * 1024 * 1024)
    return _BUDGETS


def _row_multiple(itemsize: int) -> int:
    # dtype-aware sublane packing: f32 -> 8, bf16 -> 16, int8/fp8 -> 32.
    return 8 * max(1, 4 // itemsize)


# ----------------------------------------------------------------------------
# Kernel: broadcast add (works for both layout paths via numpy broadcasting)
#   lane-flat : x (bb, ll)    + pe (1, ll)
#   3-D block : x (kb, T, ll) + pe (T, ll)
# ----------------------------------------------------------------------------
def _add_kernel(x_ref, pe_ref, o_ref):
    o_ref[...] = x_ref[...] + pe_ref[...]


# ----------------------------------------------------------------------------
# Tile selection
# ----------------------------------------------------------------------------
def _choose_tiles_flat(R: int, L: int, itemsize: int, target: int):
    """Tiles for the lane-flat (R, L) view. Row block first, lane block sized
    against the ACTUAL row block (review fix #1)."""
    rmul = _row_multiple(itemsize)
    if R <= rmul:
        bb = R                                     # full extent — always legal
    else:
        rows_full_lane = target // max(1, L * itemsize)
        if rows_full_lane >= rmul:
            bb = min((R // rmul) * rmul, (rows_full_lane // rmul) * rmul)
        else:
            bb = rmul
    lanes_fit = target // max(1, bb * itemsize)
    if lanes_fit >= L:
        ll = L
    else:
        ll = min(L, max(_LANE, (lanes_fit // _LANE) * _LANE))
    # Guarantee >= 2 grid blocks when there is more than one block of data
    # (v7x: two TensorCores only get work via grid sharding).
    if (R * L * itemsize > target and pl.cdiv(R, bb) == 1
            and pl.cdiv(L, ll) == 1 and L >= 2 * _LANE):
        ll = max(_LANE, (pl.cdiv(L, 2) // _LANE) * _LANE)
    return bb, ll


def _choose_tiles_3d(B: int, T: int, Dp: int, itemsize: int, target: int):
    """Tiles for the (B, T, D') view: block = (kb, T, ll). The leading kb dim
    is unconstrained; (T, ll) are the sublane/lane dims (T = full extent)."""
    slab = T * Dp * itemsize                       # one batch row, full lanes
    if slab <= target:
        kb = max(1, min(B, target // slab))
        ll = Dp
    else:
        kb = 1
        lanes_fit = target // max(1, T * itemsize)
        ll = min(Dp, max(_LANE, (lanes_fit // _LANE) * _LANE))
    # >= 2 grid blocks when there is more than one block of data.
    if B * slab > target and pl.cdiv(B, kb) == 1 and pl.cdiv(Dp, ll) == 1:
        if B >= 2:
            kb = max(1, pl.cdiv(B, 2))             # leading dim: any split is legal
        elif Dp >= 2 * _LANE:
            ll = max(_LANE, (pl.cdiv(Dp, 2) // _LANE) * _LANE)
    return kb, ll


# ----------------------------------------------------------------------------
# pallas_call wrappers
# ----------------------------------------------------------------------------
def _pe_add_flat(x2: jnp.ndarray, pe2: jnp.ndarray, donate: bool) -> jnp.ndarray:
    """x2: (R, L), pe2: (1, L)."""
    R, L = x2.shape
    itemsize = jnp.dtype(x2.dtype).itemsize
    target, vmem_limit = _budgets()
    bb, ll = _choose_tiles_flat(R, L, itemsize, target)
    # Grid order (lane, row): rows innermost, so pe's block index (0, j) is
    # invariant along the inner axis -> pe is DMA'd once per lane block
    # (once total when ll == L), never re-fetched per row block.
    grid = (pl.cdiv(L, ll), pl.cdiv(R, bb))
    return pl.pallas_call(
        _add_kernel,
        out_shape=jax.ShapeDtypeStruct((R, L), x2.dtype),
        grid=grid,
        in_specs=[
            pl.BlockSpec((bb, ll), lambda j, i: (i, j)),
            pl.BlockSpec((1, ll), lambda j, i: (0, j)),
        ],
        out_specs=pl.BlockSpec((bb, ll), lambda j, i: (i, j)),
        input_output_aliases=({0: 0} if donate else {}),
        compiler_params=pltpu.CompilerParams(
            dimension_semantics=("parallel", "parallel"),
            vmem_limit_bytes=vmem_limit,
        ),
    )(x2, pe2)


def _pe_add_3d(x3: jnp.ndarray, pe2: jnp.ndarray, donate: bool) -> jnp.ndarray:
    """x3: (B, T, D'), pe2: (T, D')."""
    B, T, Dp = x3.shape
    itemsize = jnp.dtype(x3.dtype).itemsize
    target, vmem_limit = _budgets()
    kb, ll = _choose_tiles_3d(B, T, Dp, itemsize, target)
    # Rows (batch blocks) innermost; pe block index (0, j) invariant along it.
    grid = (pl.cdiv(Dp, ll), pl.cdiv(B, kb))
    return pl.pallas_call(
        _add_kernel,
        out_shape=jax.ShapeDtypeStruct((B, T, Dp), x3.dtype),
        grid=grid,
        in_specs=[
            pl.BlockSpec((kb, T, ll), lambda j, i: (i, 0, j)),
            pl.BlockSpec((T, ll), lambda j, i: (0, j)),
        ],
        out_specs=pl.BlockSpec((kb, T, ll), lambda j, i: (i, 0, j)),
        input_output_aliases=({0: 0} if donate else {}),
        compiler_params=pltpu.CompilerParams(
            dimension_semantics=("parallel", "parallel"),
            vmem_limit_bytes=vmem_limit,
        ),
    )(x3, pe2)


# ----------------------------------------------------------------------------
# Forward pass — matches PositionalEncoding.forward semantics
# ----------------------------------------------------------------------------
def _layout(shape):
    if len(shape) == 3:
        B, T, D = shape
        N, Dp = 1, D
    elif len(shape) == 4:
        B, T, N, D = shape
        Dp = N * D
    else:
        raise ValueError(f"Expected 3-D or 4-D input, got shape {shape}")
    return B, T, N, Dp, (Dp >= _LANE)


def _prepare_pe_table(pe, T, N, Dp, use_3d, dtype):
    pe_t = pe[:T].astype(dtype)                 # (T, D)
    if N > 1:
        pe_t = jnp.tile(pe_t, (1, N))           # (T, N*D): tiny, no batch factor
    return pe_t if use_3d else pe_t.reshape(1, T * Dp)


def positional_encoding_forward(x, pe, *, pe_table=None, donate_input=False):
    B, T, N, Dp, use_3d = _layout(x.shape)
    if pe_table is None:
        # TODO(synk): prefer PositionalEncodingPallas below, which hoists this
        # tiny slice/cast/tile prep out of the per-call hot path via a cache.
        pe_table = _prepare_pe_table(pe, T, N, Dp, use_3d, x.dtype)
    if use_3d:
        out = _pe_add_3d(x.reshape(B, T, Dp), pe_table, donate_input)
    else:
        out = _pe_add_flat(x.reshape(B, T * Dp), pe_table, donate_input)
    return out.reshape(x.shape)


class PositionalEncodingPallas:
    """Module-style wrapper: builds the pe buffer once and caches the prepared
    (layout-ready, dtype-cast) pe table per (T, N, D', dtype)."""

    def __init__(self, d_model: int, max_len: int = 100):
        self.pe = make_pe(d_model, max_len)
        self._tables = {}

    def __call__(self, x, *, donate_input: bool = False):
        _, T, N, Dp, use_3d = _layout(x.shape)
        key = (T, N, Dp, use_3d, jnp.dtype(x.dtype).name)
        tbl = self._tables.get(key)
        if tbl is None:
            tbl = _prepare_pe_table(self.pe, T, N, Dp, use_3d, x.dtype)
            self._tables[key] = tbl
        return positional_encoding_forward(x, self.pe, pe_table=tbl,
                                           donate_input=donate_input)


# ----------------------------------------------------------------------------
# Demo / self-test
# ----------------------------------------------------------------------------
if __name__ == "__main__":
    import warnings
    warnings.filterwarnings("ignore", message=".*donat.*")

    key = jax.random.PRNGKey(0)
    k1, k2, k3, k4 = jax.random.split(key, 4)

    d_model = 32
    pe = make_pe(d_model, max_len=100)

    # 1) 4-D (B, T, N, D): D' = N*D = 128 -> lane-dense 3-D-block path.
    B, T, N, D = 2, 8, 4, d_model
    x4 = jax.random.normal(k1, (B, T, N, D), dtype=jnp.float32)
    ref4 = x4 + pe[:T][None, :, None, :]
    out4 = jax.block_until_ready(positional_encoding_forward(x4, pe))
    assert out4.shape == x4.shape and jnp.allclose(out4, ref4, atol=1e-6), "4D mismatch"

    # 2) 3-D (B, T, D): D = 32 < 128 -> lane-flat path (lanes = T*D).
    x3 = jax.random.normal(k2, (B, T, D), dtype=jnp.float32)
    ref3 = x3 + pe[:T][None, :, :]
    out3 = jax.block_until_ready(positional_encoding_forward(x3, pe))
    assert jnp.allclose(out3, ref3, atol=1e-6), "3D mismatch"

    # 3) 3-D with ragged row tiling (B=10 -> 8-row blocks + masked tail block).
    x3b = jax.random.normal(k3, (10, T, D), dtype=jnp.float32)
    ref3b = x3b + pe[:T][None, :, :]
    out3b = jax.block_until_ready(positional_encoding_forward(x3b, pe))
    assert jnp.allclose(out3b, ref3b, atol=1e-6), "3D ragged mismatch"

    # 4) bf16 4-D: exercises the dtype-aware (16, 128) tile path.
    pe64 = make_pe(64, max_len=100)
    x4h = jax.random.normal(k4, (4, 16, 2, 64), dtype=jnp.bfloat16)
    ref4h = x4h + pe64[:16].astype(jnp.bfloat16)[None, :, None, :]
    out4h = jax.block_until_ready(positional_encoding_forward(x4h, pe64))
    assert jnp.allclose(out4h.astype(jnp.float32), ref4h.astype(jnp.float32),
                        atol=1e-2), "bf16 4D mismatch"

    # 5) input_output_aliases under jit (x donated; not reused afterwards).
    fwd_donate = jax.jit(partial(positional_encoding_forward, donate_input=True),
                         donate_argnums=(0,))
    x4_donor = x4 + 0.0
    out4d = jax.block_until_ready(fwd_donate(x4_donor, pe))
    assert jnp.allclose(out4d, ref4, atol=1e-6), "donated 4D mismatch"

    # 6) Module-style wrapper with a cached, pre-laid-out pe table.
    enc = PositionalEncodingPallas(d_model, max_len=100)
    outc = jax.block_until_ready(enc(x4))
    outc2 = jax.block_until_ready(enc(x4))    # second call hits the table cache
    assert jnp.allclose(outc, ref4, atol=1e-6) and jnp.allclose(outc2, ref4, atol=1e-6)

    print("KERNEL_OK")
</pallas_src>

<mosaic_0001>
module attributes {stable_mosaic.version = 11 : i64} {
  func.func @_add_kernel(%arg0: i32, %arg1: i32, %arg2: memref<2x8x128xf32, #tpu.memory_space<vmem>>, %arg3: memref<8x128xf32, #tpu.memory_space<vmem>>, %arg4: memref<2x8x128xf32, #tpu.memory_space<vmem>>) attributes {dimension_semantics = [#tpu.dimension_semantics<parallel>, #tpu.dimension_semantics<parallel>], iteration_bounds = array<i64: 1, 1>, scalar_prefetch = 0 : i64, scratch_operands = 0 : i64, tpu.core_type = #tpu.core_type<tc>, window_params = [{transform_indices = @transform_0, window_bounds = array<i64: 2, 8, 128>}, {transform_indices = @transform_1, window_bounds = array<i64: 8, 128>}, {transform_indices = @transform_2, window_bounds = array<i64: 2, 8, 128>}]} {
    %c0 = arith.constant 0 : index
    %c0_0 = arith.constant 0 : index
    %c0_1 = arith.constant 0 : index
    %0 = vector.load %arg2[%c0, %c0_0, %c0_1] : memref<2x8x128xf32, #tpu.memory_space<vmem>>, vector<2x8x128xf32>
    %c0_2 = arith.constant 0 : index
    %c0_3 = arith.constant 0 : index
    %1 = vector.load %arg3[%c0_2, %c0_3] : memref<8x128xf32, #tpu.memory_space<vmem>>, vector<8x128xf32>
    %2 = vector.shape_cast %1 : vector<8x128xf32> to vector<1x8x128xf32>
    %3 = vector.broadcast %2 : vector<1x8x128xf32> to vector<2x8x128xf32>
    %4 = arith.addf %0, %3 : vector<2x8x128xf32>
    %c0_4 = arith.constant 0 : index
    %c0_5 = arith.constant 0 : index
    %c0_6 = arith.constant 0 : index
    %5 = vector.load %arg4[%c0_4, %c0_5, %c0_6] : memref<2x8x128xf32, #tpu.memory_space<vmem>>, vector<2x8x128xf32>
    tpu.vector_store %arg4[%c0_4, %c0_5, %c0_6], %4 {strides = array<i32>} : memref<2x8x128xf32, #tpu.memory_space<vmem>>, vector<2x8x128xf32>,
    return
  }
  func.func @transform_0(%arg0: i32, %arg1: i32) -> (i32, i32, i32) {
    %c0_i32 = arith.constant 0 : i32
    %c0_i32_0 = arith.constant 0 : i32
    return %arg1, %c0_i32, %arg0 : i32, i32, i32
  }
  func.func @transform_1(%arg0: i32, %arg1: i32) -> (i32, i32) {
    %c0_i32 = arith.constant 0 : i32
    %c0_i32_0 = arith.constant 0 : i32
    return %c0_i32, %arg0 : i32, i32
  }
  func.func @transform_2(%arg0: i32, %arg1: i32) -> (i32, i32, i32) {
    %c0_i32 = arith.constant 0 : i32
    %c0_i32_0 = arith.constant 0 : i32
    return %arg1, %c0_i32, %arg0 : i32, i32, i32
  }
}

</mosaic_0001>

<bundles_post_ra>
// kernel: tpu_custom_call.1
= control target key start
LH: loop header
LB: loop body
LE: loop exit
PB: predicated region body
PF: predicated region fallthrough
CT: control target
= control target key end

     0   :  { %7 = vsyncpa [#allocation3], 0  ;;  %s202_s0 = inlined_call_operand.hbm [shape: f32[2,8,128], index: 0, kind: input, shape index: {}]   ;;  %s203_s1 = inlined_call_operand.hbm [shape: f32[8,128], index: 1, kind: input, shape index: {}]   ;;  %s204_s2 = inlined_call_operand.hbm [shape: f32[2,8,128], index: 2, kind: output, shape index: {}]  }
   0x1   :  { %8 = vsyncpa [#allocation6], 0 }
   0x2   :  { %9 = vsyncpa [#allocation4], 0  ;;  %s140_s9 = smov [#allocation2]   ;;  %s68_s13 = scalar_lea.hbm %s202_s0, 256 }
   0x3   :  { %s15_s10 = sshll.u32 %s140_s9, 4  ;;  %p69_p0 = scmp.ne.s32.totalorder %s202_s0, %s68_s13  ;;  %s16_s10 = int_to_ptr.vmem [resolvable:$true] %s15_s10 }
   0x4   :  { %p72_p1 = scmp.lt.u32.totalorder %s68_s13, %s202_s0 }
   0x6   :  { %p74_p2 = pnand %p72_p1, %p69_p0 }
   0x8   :  { %77 = shalt.err (!%p74_p2)
}
   0x9   :  { %s78_s18 = scalar_lea.vmem %s16_s10, 256  ;;  %p83_p4 = scmp.lt.s32.totalorder %s16_s10, %s16_s10 }
   0xa   :  { %p79_p3 = scmp.ne.s32.totalorder %s16_s10, %s78_s18  ;;  %p84_p5 = scmp.lt.s32.totalorder %s78_s18, %s78_s18 }
   0xc   :  { %p85_p6 = por %p84_p5, %p83_p4 }
   0xe   :  { %p86_p7 = pnand %p85_p6, %p79_p3 }
  0x10   :  { %89 = shalt.err (!%p86_p7)
}
  0x11   :  { %s141_s19 = smov 128   ;;  %s142_s20 = smov 8  }
  0x12   :  { %21 = dma.hbm_to_vmem [thread:$0]  %s202_s0, 256, %s16_s10, [#allocation3], %s141_s19, %s141_s19, %s142_s20  }
  0x13   :  { %s143_s23 = smov [#allocation5]   ;;  %s90_s27 = scalar_lea.hbm %s203_s1, 128 }
  0x14   :  { %s28_s24 = sshll.u32 %s143_s23, 4  ;;  %p91_p8 = scmp.ne.s32.totalorder %s203_s1, %s90_s27  ;;  %s29_s24 = int_to_ptr.vmem [resolvable:$true] %s28_s24 }
  0x15   :  { %p94_p9 = scmp.lt.u32.totalorder %s90_s27, %s203_s1 }
  0x17   :  { %p96_p10 = pnand %p94_p9, %p91_p8 }
  0x19   :  { %99 = shalt.err (!%p96_p10)
}
  0x1a   :  { %s100_s4 = scalar_lea.vmem %s29_s24, 128  ;;  %p105_p12 = scmp.lt.s32.totalorder %s29_s24, %s29_s24 }
  0x1b   :  { %p101_p11 = scmp.ne.s32.totalorder %s29_s24, %s100_s4  ;;  %p106_p13 = scmp.lt.s32.totalorder %s100_s4, %s100_s4 }
  0x1d   :  { %p107_p0 = por %p106_p13, %p105_p12 }
  0x1f   :  { %p108_p1 = pnand %p107_p0, %p101_p11 }
  0x21   :  { %111 = shalt.err (!%p108_p1)
}
  0x22   :  { %31 = dma.hbm_to_vmem [thread:$0]  %s203_s1, 128, %s29_s24, [#allocation6]  }
  0x23   :  { %134 = dma.done.wait [#allocation3], 256  }
  0x24   :  { %135 = vsyncadd [#allocation3], 4294967040 }
  0x25   :  { %136 = dma.done.wait [#allocation6], 128  }
  0x26   :  { %137 = vsyncadd [#allocation6], 4294967168  ;;  %s144_s6 = smov [#allocation7]   ;;  %v38_v0 = vld [vmem:[#allocation2] sm:$0xff]  ;;  %v40_v1 = vld [vmem:[#allocation5] sm:$0xff] }
  0x27   :  { %s50_s7 = sshll.u32 %s144_s6, 4  ;;  %v39_v2 = vld [vmem:[#allocation2 + $0x8] sm:$0xff]  ;;  %v41_v3 = vadd.f32 %v40_v1, %v38_v0  ;;  %s51_s7 = int_to_ptr.vmem [resolvable:$true] %s50_s7 }
  0x28   :  { %v42_v4 = vadd.f32 %v40_v1, %v39_v2  ;;  %s112_s8 = scalar_lea.vmem %s51_s7, 256  ;;  %p117_p3 = scmp.lt.s32.totalorder %s51_s7, %s51_s7 }
  0x29   :  { %43 = vst [vmem:[#allocation7] sm:$0xff] %v41_v3  ;;  %p113_p2 = scmp.ne.s32.totalorder %s51_s7, %s112_s8  ;;  %p118_p4 = scmp.lt.s32.totalorder %s112_s8, %s112_s8 }
  0x2a   :  { %44 = vst [vmem:[#allocation7 + $0x8] sm:$0xff] %v42_v4 }
  0x2b   :  { %p119_p5 = por %p118_p4, %p117_p3 }
  0x2d   :  { %p120_p6 = pnand %p119_p5, %p113_p2 }
  0x2f   :  { %123 = shalt.err (!%p120_p6)
}
  0x30   :  { %s124_s10 = scalar_lea.hbm %s204_s2, 256 }
  0x31   :  { %p125_p7 = scmp.ne.s32.totalorder %s204_s2, %s124_s10  ;;  %p128_p8 = scmp.lt.u32.totalorder %s124_s10, %s204_s2 }
  0x33   :  { %p130_p9 = pnand %p128_p8, %p125_p7 }
  0x35   :  { %133 = shalt.err (!%p130_p9)
}
  0x36   :  { %56 = dma.vmem_to_hbm [thread:$0]  %s51_s7, 256, %s204_s2, [#allocation4], %s141_s19, %s141_s19, %s142_s20  }
  0x37   :  { %138 = dma.done.wait [#allocation4], 256  }
  0x38   :  { %139 = vsyncadd [#allocation4], 4294967040 }
  0x39   :  { %60 = vsyncpa [#allocation3], 1 }
  0x3a   :  { %61 = vsyncpa [#allocation6], 1 }
  0x3b   :  { %62 = vsyncpa [#allocation4], 1 }

</bundles_post_ra>
